<compile_context>
chip_gen: v5e
topology: v5e:2x2
jax: 0.10.0
libtpu: 0.0.40
codegen_flags: <defaults>
</compile_context>

<pallas_src>
import functools

import jax
import jax.numpy as jnp
from jax.experimental import pallas as pl
from jax.experimental.pallas import tpu as pltpu


def _depth_kernel(w_ref, x_ref, o_ref, *, num_channels):
    # x_ref: (BN, C, TILE) float32 block, lane-dense last dim.
    # w_ref: (C,)          float32 channel weights in SMEM, pre-scaled by 1/255.
    # o_ref: (BN, 1, TILE) float32 synthetic depth block.
    x = x_ref[...]

    # uint8 quantization semantics of the original forward:
    #   np.round(x * 255).astype(np.uint8)
    # jnp.round matches numpy round-half-to-even; clamp keeps the uint8 range
    # (inputs assumed in [0, 1]; numpy's cast would wrap mod 256 outside it).
    q = jnp.clip(jnp.round(x * 255.0), 0.0, 255.0)

    # Synthetic depth head: per-channel weighted reduction (weights already / 255).
    acc = w_ref[0] * q[:, 0:1, :]
    for c in range(1, num_channels):
        acc = acc + w_ref[c] * q[:, c:c + 1, :]

    o_ref[...] = acc


def _largest_lane_tile(hw, max_lanes):
    """Largest multiple of 128 that divides hw and is <= max_lanes (or None)."""
    best = None
    t = 128
    limit = min(hw, max_lanes)
    while t <= limit:
        if hw % t == 0:
            best = t
        t += 128
    return best


def google_api_wrapper_forward(input_image, channel_weights):
    """input_image: (N, C, H, W) float32 in [0,1] -> (N, 1, H, W) float32."""
    n, c, h, w = input_image.shape
    hw = h * w

    # Lane-dense layout: flatten spatial dims so the last block dim is H*W.
    x = input_image.reshape(n, c, hw)
    # Fold the trailing 1/255 rescale into the weights (host-side, one-time).
    w_scaled = (channel_weights.reshape(-1).astype(jnp.float32)) / 255.0

    # Per-input-tile byte budget: fits a double-buffered pipeline comfortably
    # inside v5e's 16 MiB / v7x's 32 MiB default scoped-VMEM limits.
    target_bytes = 2 * 1024 * 1024
    bytes_per_image = c * hw * 4

    if bytes_per_image <= target_bytes:
        # Small images: block several whole (flattened) images per grid step.
        bn = 1
        for d in range(n, 0, -1):
            if n % d == 0 and d * bytes_per_image <= target_bytes:
                bn = d
                break
        tile = hw
    else:
        # Large images: tile the flattened spatial axis with lane-dense blocks.
        bn = 1
        max_lanes = max(128, target_bytes // (c * 4))
        tile = _largest_lane_tile(hw, max_lanes) or hw

    grid = (n // bn, hw // tile)
    kernel = functools.partial(_depth_kernel, num_channels=c)

    out_flat = pl.pallas_call(
        kernel,
        out_shape=jax.ShapeDtypeStruct((n, 1, hw), jnp.float32),
        grid=grid,
        in_specs=[
            pl.BlockSpec(memory_space=pltpu.MemorySpace.SMEM),        # (C,) weights
            pl.BlockSpec((bn, c, tile), lambda i, j: (i, 0, j)),      # image block
        ],
        out_specs=pl.BlockSpec((bn, 1, tile), lambda i, j: (i, 0, j)),
        compiler_params=pltpu.CompilerParams(
            dimension_semantics=("parallel", "parallel")),
    )(w_scaled, x)

    return out_flat.reshape(n, 1, h, w)


if __name__ == "__main__":
    # Small shapes consistent with the module: batch of RGB images, NCHW.
    N, C, H, W = 2, 3, 16, 16

    key = jax.random.PRNGKey(0)
    input_image = jax.random.uniform(key, (N, C, H, W), dtype=jnp.float32)

    # Deterministic "parameters" for the synthetic depth head (luminance weights).
    channel_weights = jnp.array([0.299, 0.587, 0.114], dtype=jnp.float32)  # (C,)

    out = google_api_wrapper_forward(input_image, channel_weights)
    out = jax.block_until_ready(out)

    # Pure-JAX reference for sanity checking the in-kernel math.
    q_ref = jnp.clip(jnp.round(input_image * 255.0), 0.0, 255.0)
    ref = jnp.sum(q_ref * channel_weights.reshape(1, C, 1, 1),
                  axis=1, keepdims=True) / 255.0

    assert out.shape == (N, 1, H, W)
    assert out.dtype == jnp.float32
    assert jnp.allclose(out, ref, atol=1e-5, rtol=1e-5)

    print("KERNEL_OK")
</pallas_src>

<mosaic_0001>
module attributes {stable_mosaic.version = 11 : i64} {
  func.func @_depth_kernel(%arg0: i32, %arg1: i32, %arg2: memref<3xf32, #tpu.memory_space<smem>>, %arg3: memref<2x3x256xf32, #tpu.memory_space<vmem>>, %arg4: memref<2x1x256xf32, #tpu.memory_space<vmem>>) attributes {dimension_semantics = [#tpu.dimension_semantics<parallel>, #tpu.dimension_semantics<parallel>], iteration_bounds = array<i64: 1, 1>, scalar_prefetch = 0 : i64, scratch_operands = 0 : i64, tpu.core_type = #tpu.core_type<tc>, window_params = [{transform_indices = @transform_0, window_bounds = array<i64: 3>}, {transform_indices = @transform_1, window_bounds = array<i64: 2, 3, 256>}, {transform_indices = @transform_2, window_bounds = array<i64: 2, 1, 256>}]} {
    %c0 = arith.constant 0 : index
    %c0_0 = arith.constant 0 : index
    %c0_1 = arith.constant 0 : index
    %0 = vector.load %arg3[%c0, %c0_0, %c0_1] : memref<2x3x256xf32, #tpu.memory_space<vmem>>, vector<2x3x256xf32>
    %cst = arith.constant 2.550000e+02 : f32
    %1 = vector.broadcast %cst : f32 to vector<2x3x256xf32>
    %2 = arith.mulf %0, %1 : vector<2x3x256xf32>
    %3 = math.roundeven %2 : vector<2x3x256xf32>
    %cst_2 = arith.constant 0.000000e+00 : f32
    %cst_3 = arith.constant 2.550000e+02 : f32
    %4 = vector.broadcast %cst_2 : f32 to vector<2x3x256xf32>
    %5 = arith.maximumf %4, %3 : vector<2x3x256xf32>
    %6 = vector.broadcast %cst_3 : f32 to vector<2x3x256xf32>
    %7 = arith.minimumf %6, %5 : vector<2x3x256xf32>
    %c0_4 = arith.constant 0 : index
    %8 = memref.load %arg2[%c0_4] : memref<3xf32, #tpu.memory_space<smem>>
    %9 = vector.extract_strided_slice %7 {offsets = [0, 0, 0], sizes = [2, 1, 256], strides = [1, 1, 1]} : vector<2x3x256xf32> to vector<2x1x256xf32>
    %10 = vector.broadcast %8 : f32 to vector<2x1x256xf32>
    %11 = arith.mulf %10, %9 : vector<2x1x256xf32>
    %c1 = arith.constant 1 : index
    %12 = memref.load %arg2[%c1] : memref<3xf32, #tpu.memory_space<smem>>
    %13 = vector.extract_strided_slice %7 {offsets = [0, 1, 0], sizes = [2, 1, 256], strides = [1, 1, 1]} : vector<2x3x256xf32> to vector<2x1x256xf32>
    %14 = vector.broadcast %12 : f32 to vector<2x1x256xf32>
    %15 = arith.mulf %14, %13 : vector<2x1x256xf32>
    %16 = arith.addf %11, %15 : vector<2x1x256xf32>
    %c2 = arith.constant 2 : index
    %17 = memref.load %arg2[%c2] : memref<3xf32, #tpu.memory_space<smem>>
    %18 = vector.extract_strided_slice %7 {offsets = [0, 2, 0], sizes = [2, 1, 256], strides = [1, 1, 1]} : vector<2x3x256xf32> to vector<2x1x256xf32>
    %19 = vector.broadcast %17 : f32 to vector<2x1x256xf32>
    %20 = arith.mulf %19, %18 : vector<2x1x256xf32>
    %21 = arith.addf %16, %20 : vector<2x1x256xf32>
    %c0_5 = arith.constant 0 : index
    %c0_6 = arith.constant 0 : index
    %c0_7 = arith.constant 0 : index
    %22 = vector.load %arg4[%c0_5, %c0_6, %c0_7] : memref<2x1x256xf32, #tpu.memory_space<vmem>>, vector<2x1x256xf32>
    tpu.vector_store %arg4[%c0_5, %c0_6, %c0_7], %21 {strides = array<i32>} : memref<2x1x256xf32, #tpu.memory_space<vmem>>, vector<2x1x256xf32>,
    return
  }
  func.func @transform_0(%arg0: i32, %arg1: i32) -> i32 {
    %c0_i32 = arith.constant 0 : i32
    %c0_i32_0 = arith.constant 0 : i32
    return %c0_i32 : i32
  }
  func.func @transform_1(%arg0: i32, %arg1: i32) -> (i32, i32, i32) {
    %c0_i32 = arith.constant 0 : i32
    %c0_i32_0 = arith.constant 0 : i32
    return %arg0, %c0_i32, %arg1 : i32, i32, i32
  }
  func.func @transform_2(%arg0: i32, %arg1: i32) -> (i32, i32, i32) {
    %c0_i32 = arith.constant 0 : i32
    %c0_i32_0 = arith.constant 0 : i32
    return %arg0, %c0_i32, %arg1 : i32, i32, i32
  }
}

</mosaic_0001>

<bundles_post_ra>
// kernel: tpu_custom_call.1
= control target key start
LH: loop header
LB: loop body
LE: loop exit
PB: predicated region body
PF: predicated region fallthrough
CT: control target
= control target key end

     0   :  { %7 = vsyncpa [#allocation4], 0  ;;  %s198_s0 = inlined_call_operand.vmem [shape: f32[3], index: 0, kind: input, shape index: {}]   ;;  %s199_s1 = inlined_call_operand.vmem [shape: f32[2,3,256], index: 1, kind: input, shape index: {}]   ;;  %s200_s2 = inlined_call_operand.hbm [shape: f32[2,1,256], index: 2, kind: output, shape index: {}]  }
   0x1   :  { %8 = vsyncpa [#allocation3], 0  ;;  %s14_s11 = sshll.u32 %s198_s0, 4  ;;  %s167_s12 = smov [#allocation2]   ;;  %s15_s11 = int_to_ptr.vmem [resolvable:$true] %s14_s11 }
   0x2   :  { %17 = dma.vmem_to_smem %s15_s11, 16, %s167_s12, [#allocation4]  }
   0x3   :  { %163 = dma.done.wait [#allocation4], 16  }
   0x4   :  { %164 = vsyncadd [#allocation4], 4294967280 }
   0x5   :  { %24 = sfence }
   0x6   :  { %v25_v0 = vld [vmem:[%s199_s1] sm:$0x77]  ;;  %v26_v2 = vld [vmem:[%s199_s1 + $0x8] sm:$0x77]  ;;  %s35_s17 = sld [smem:[#allocation2]]  ;;  %v76_v36 = vlaneseq  ;;  %s168_s1 = smov [#allocation5]  }
   0x7   :  { %v27_v1 = vmul.f32 255.0, %v25_v0  ;;  %v28_v3 = vmul.f32 255.0, %v26_v2  ;;  %s101_s0 = sld [smem:[#allocation2 + $0x1]]  ;;  %s86_s19 = sshll.u32 %s168_s1, 4  ;;  %vm71_vm2 = vcmask 1040384   ;;  %s87_s19 = int_to_ptr.vmem [resolvable:$true] %s86_s19 }
   0x8   :  { %s104_s18 = sld [smem:[#allocation2 + $0x2]]  ;;  %s88_s22 = sshll.u32 %s200_s2, 4  ;;  %vm78_vm3 = vcmp.lt.s32.totalorder %v76_v36, 256  ;;  %s89_s22 = int_to_ptr.hbm [resolvable:$true] %s88_s22 }
   0x9   :  { %v109_v4 = vcvt.f32.s32 %v27_v1  ;;  %v107_v5 = vand.u32 2147483647, %v27_v1  ;;  %v117_v6 = vcvt.f32.s32 %v28_v3  ;;  %v112_v8 = vand.u32 2147483648, %v27_v1  ;;  %s169_s23 = smov 32   ;;  %s170_s24 = smov 2  }
   0xa   :  { %v115_v9 = vand.u32 2147483647, %v28_v3  ;;  %v120_v11 = vand.u32 2147483648, %v28_v3 }
   0xb   :  { %v110_v7 = vcvt.s32.f32 %v109_v4  ;;  %v118_v10 = vcvt.s32.f32 %v117_v6  ;;  %vm108_vm0 = vcmp.lt.f32.partialorder %v107_v5, 8388608.0 }
   0xc   :  { %vm116_vm1 = vcmp.lt.f32.partialorder %v115_v9, 8388608.0  ;;  %v36_v19 = vstv %s35_s17 }
   0xd   :  { %v111_v12 = vand.u32 2147483647, %v110_v7  ;;  %v119_v13 = vand.u32 2147483647, %v118_v10  ;;  %v40_v20 = vstv %s101_s0 }
   0xe   :  { %v54_v21 = vstv %s104_s18 }
   0xf   :  { %v113_v14 = vor.u32 %v112_v8, %v111_v12  ;;  %v121_v15 = vor.u32 %v120_v11, %v119_v13 }
  0x11   :  { %v114_v16 = vsel %vm108_vm0, %v113_v14, %v27_v1  ;;  %v122_v18 = vsel %vm116_vm1, %v121_v15, %v28_v3 }
  0x12   :  { %v31_v17 = vmax.f32 %v114_v16, 0.0  ;;  %v32_v22 = vmax.f32 %v122_v18, 0.0 }
  0x14   :  { %v33_v23 = vmin.f32 %v31_v17, 255.0  ;;  %v34_v24 = vmin.f32 %v32_v22, 255.0 }
  0x16   :  { %v37_v25 = vmul.f32 %v36_v19, %v33_v23  ;;  %v41_v26 = vmul.f32 %v40_v20, %v33_v23  ;;  %v55_v27 = vmul.f32 %v54_v21, %v33_v23  ;;  %v38_v28 = vmul.f32 %v36_v19, %v34_v24 }
  0x17   :  { %v42_v29 = vmul.f32 %v40_v20, %v34_v24  ;;  %v56_v30 = vmul.f32 %v54_v21, %v34_v24 }
  0x18   :  { %v102_v31 = vrot.slane %v41_v26, 9  ;;  %v105_v32 = vrot.slane %v55_v27, 10 }
  0x19   :  { %v103_v33 = vrot.slane %v42_v29, 9  ;;  %v106_v34 = vrot.slane %v56_v30, 10 }
  0x1a   :  { %v51_v35 = vadd.f32 %v102_v31, %v37_v25 }
  0x1b   :  { %v52_v37 = vadd.f32 %v103_v33, %v38_v28 }
  0x1c   :  { %v65_v38 = vadd.f32 %v105_v32, %v51_v35 }
  0x1d   :  { %v66_v39 = vadd.f32 %v106_v34, %v52_v37 }
  0x1e   :  { %v69_v40 = vrot.slane %v65_v38, 3 }
  0x1f   :  { %v70_v41 = vrot.slane %v66_v39, 3 }
  0x20   :  { %v72_v42 = vsel %vm71_vm2, %v65_v38, %v69_v40 }
  0x21   :  { %80 = vst.msk [vmem:[#allocation5] sm:$0x3] %vm78_vm3, %v72_v42  ;;  %v73_v43 = vsel %vm71_vm2, %v66_v39, %v70_v41 }
  0x22   :  { %81 = vst.msk [vmem:[#allocation5 + $0x2] sm:$0x3] %vm78_vm3, %v73_v43 }
  0x23   :  { %94 = dma.vmem_to_hbm [thread:$0]  %s87_s19, 64, %s89_s22, [#allocation3], %s169_s23, %s169_s23, %s170_s24  }
  0x24   :  { %165 = dma.done.wait [#allocation3], 64  }
  0x25   :  { %166 = vsyncadd [#allocation3], 4294967232 }
  0x26   :  { %99 = vsyncpa [#allocation3], 1 }
  0x27   :  { %100 = vsyncpa [#allocation4], 1 }

</bundles_post_ra>
